<compile_context>
chip_gen: v5e
topology: v5e:2x2
jax: 0.10.0
libtpu: 0.0.40
codegen_flags: <defaults>
</compile_context>

<pallas_src>
import functools

import jax
import jax.numpy as jnp
from jax import lax
from jax.experimental import pallas as pl
from jax.experimental.pallas import tpu as pltpu


# SimpleNN layer dims: 6 -> 10 -> 10 -> 10 -> 10 -> 3
_IN_DIMS = (6, 10, 10, 10, 10)
_OUT_DIMS = (10, 10, 10, 10, 3)
_N_LAYERS = 5
_CHUNK = 512          # lanes per inner-loop step (caps vreg pressure ~30 vregs)


def _round_up(n, m):
    return ((n + m - 1) // m) * m


def _mlp_kernel(x_ref, p_ref, o_ref):
    """One batch tile, batch-in-lanes.

    x_ref : (6, TB)      f32  activations, batch on the lane axis
    p_ref : (5, 10, 11)  f32  packed [W_i | b_i] per layer (zero padded)
    o_ref : (3, TB)      f32
    """
    tb = x_ref.shape[1]
    assert tb % _CHUNK == 0
    n_chunks = tb // _CHUNK

    # Hoist the tiny parameter loads out of the chunk loop (stay in vregs).
    ws, bs = [], []
    for li in range(_N_LAYERS):
        o, i = _OUT_DIMS[li], _IN_DIMS[li]
        ws.append(p_ref[li, :o, :i])            # (out, in)
        bs.append(p_ref[li, :o, i:i + 1])       # (out, 1) -> lane broadcast

    def body(c, carry):
        start = pl.multiple_of(c * _CHUNK, _CHUNK)
        h = x_ref[:, pl.ds(start, _CHUNK)]                      # (6, CHUNK)
        for li in range(_N_LAYERS):
            h = jnp.dot(ws[li], h,
                        preferred_element_type=jnp.float32) + bs[li]
            if li < _N_LAYERS - 1:
                h = jnp.maximum(h, 0.0)
        o_ref[:, pl.ds(start, _CHUNK)] = h                      # (3, CHUNK)
        return carry

    # Unrolled for short trip counts (LLO visibility); partial unroll otherwise.
    unroll = True if n_chunks <= 16 else 8
    lax.fori_loop(0, n_chunks, body, 0, unroll=unroll)


def _pack_params(params):
    """Pack the 10 tiny W/b arrays into one (5, 10, 11) f32 buffer so the kernel
    prologue issues a single parameter DMA instead of ten ~240 B ones."""
    max_out = max(_OUT_DIMS)
    max_in = max(_IN_DIMS)
    packed = jnp.zeros((_N_LAYERS, max_out, max_in + 1), jnp.float32)
    for li, (w, b) in enumerate(params):
        o, i = w.shape
        packed = packed.at[li, :o, :i].set(w.astype(jnp.float32))
        packed = packed.at[li, :o, i].set(b.reshape(-1).astype(jnp.float32))
    return packed


def _forward_feature_major(x_fm, packed, *, tb, core_parallel):
    """x_fm: (6, B) feature-major. Returns (3, B). No wrapper transposes."""
    in_dim, B = x_fm.shape
    out_dim = _OUT_DIMS[-1]

    # Adaptive tile: pad B only to a multiple of the chunk, split evenly across
    # tiles so unlucky batch sizes don't pay a nearly-empty last tile.
    tb = max(_round_up(tb, _CHUNK), _CHUNK)
    n_tiles = pl.cdiv(B, tb)
    TB = _round_up(pl.cdiv(B, n_tiles), _CHUNK)
    B_pad = n_tiles * TB

    x_p = jnp.pad(x_fm, ((0, 0), (0, B_pad - B))) if B_pad != B else x_fm

    if core_parallel:
        # v7x: let both TensorCores pick up grid iterations.
        sem = getattr(pltpu, "CORE_PARALLEL", pltpu.PARALLEL)
    else:
        sem = pltpu.PARALLEL

    out_fm = pl.pallas_call(
        _mlp_kernel,
        out_shape=jax.ShapeDtypeStruct((out_dim, B_pad), jnp.float32),
        grid=(n_tiles,),
        in_specs=[
            pl.BlockSpec((in_dim, TB), lambda i: (0, i)),
            # Constant index_map -> packed params DMA'd once, VMEM-resident.
            pl.BlockSpec(packed.shape, lambda i: (0, 0, 0)),
        ],
        out_specs=pl.BlockSpec((out_dim, TB), lambda i: (0, i)),
        compiler_params=pltpu.CompilerParams(dimension_semantics=(sem,)),
    )(x_p, packed)

    # Padded batch lanes hold bias-propagated garbage; slice them away.
    return out_fm[:, :B]


@functools.partial(jax.jit, static_argnames=("tb", "core_parallel"))
def simple_nn_forward_feature_major(x_fm, params, *, tb=8192,
                                    core_parallel=False):
    """Zero-transpose path: x_fm (6, B) f32 -> (3, B) f32."""
    return _forward_feature_major(x_fm, _pack_params(params),
                                  tb=tb, core_parallel=core_parallel)


@functools.partial(jax.jit, static_argnames=("tb", "core_parallel"))
def simple_nn_forward(x, params, *, tb=8192, core_parallel=False):
    """PyTorch-layout wrapper: x (B, 6) f32 -> (B, 3) f32.

    The input/output transposes are layout plumbing done once under this jit
    (they fuse with the pad/slice); for end-to-end feature-major pipelines use
    `simple_nn_forward_feature_major` and skip them entirely.
    """
    packed = _pack_params(params)
    out_fm = _forward_feature_major(x.T, packed, tb=tb,
                                    core_parallel=core_parallel)
    return out_fm.T


def init_params(key):
    """Deterministic init mimicking PyTorch nn.Linear default:
    U(-1/sqrt(fan_in), 1/sqrt(fan_in)) for weight and bias.
    Weights kept in PyTorch (out, in) layout; bias stored (out,)."""
    dims = list(zip(_IN_DIMS, _OUT_DIMS))
    params = []
    for fan_in, fan_out in dims:
        key, kw, kb = jax.random.split(key, 3)
        bound = 1.0 / jnp.sqrt(fan_in)
        w = jax.random.uniform(kw, (fan_out, fan_in), jnp.float32, -bound, bound)
        b = jax.random.uniform(kb, (fan_out,), jnp.float32, -bound, bound)
        params.append((w, b))
    return params


def reference_forward(x, params):
    h = x
    for i, (w, b) in enumerate(params):
        h = jnp.dot(h, w.T, precision=jax.lax.Precision.HIGHEST) + b
        if i < len(params) - 1:
            h = jnp.maximum(h, 0.0)
    return h


if __name__ == "__main__":
    key = jax.random.PRNGKey(0)
    params = init_params(key)

    # 1) Small inference-style batch: single tile, single parameter DMA.
    key, kx = jax.random.split(key)
    B = 8
    x = jax.random.normal(kx, (B, 6), jnp.float32)
    out = jax.block_until_ready(simple_nn_forward(x, params))
    ref = reference_forward(x, params)
    assert out.shape == (B, 3)
    assert jnp.allclose(out, ref, atol=5e-5, rtol=5e-5)

    # 2) One tile, multiple inner lane-chunks (TB=1536 -> 3 chunks of 512).
    key, kx2 = jax.random.split(key)
    B2 = 1500
    x2 = jax.random.normal(kx2, (B2, 6), jnp.float32)
    out2 = jax.block_until_ready(simple_nn_forward(x2, params))
    ref2 = reference_forward(x2, params)
    assert out2.shape == (B2, 3)
    assert jnp.allclose(out2, ref2, atol=5e-5, rtol=5e-5)

    # 3) Multi-tile grid (tb=512 -> 3 tiles) + adaptive padding to 512-lane
    #    granularity only (exercises the batch grid / remainder handling).
    out3 = jax.block_until_ready(simple_nn_forward(x2, params, tb=512))
    assert out3.shape == (B2, 3)
    assert jnp.allclose(out3, ref2, atol=5e-5, rtol=5e-5)

    print("KERNEL_OK")
</pallas_src>

<mosaic_0001>
module attributes {stable_mosaic.version = 11 : i64} {
  func.func @_mlp_kernel(%arg0: i32, %arg1: memref<6x512xf32, #tpu.memory_space<vmem>>, %arg2: memref<5x10x11xf32, #tpu.memory_space<vmem>>, %arg3: memref<3x512xf32, #tpu.memory_space<vmem>>) attributes {dimension_semantics = [#tpu.dimension_semantics<parallel>], iteration_bounds = array<i64: 1>, scalar_prefetch = 0 : i64, scratch_operands = 0 : i64, tpu.core_type = #tpu.core_type<tc>, window_params = [{transform_indices = @transform_0, window_bounds = array<i64: 6, 512>}, {pipeline_mode = #tpu.pipeline_mode<synchronous>, transform_indices = @transform_1, window_bounds = array<i64: 5, 10, 11>}, {transform_indices = @transform_2, window_bounds = array<i64: 3, 512>}]} {
    %c0 = arith.constant 0 : index
    %c0_0 = arith.constant 0 : index
    %c0_1 = arith.constant 0 : index
    %0 = vector.load %arg2[%c0, %c0_0, %c0_1] : memref<5x10x11xf32, #tpu.memory_space<vmem>>, vector<1x10x6xf32>
    %1 = vector.shape_cast %0 : vector<1x10x6xf32> to vector<10x6xf32>
    %c0_2 = arith.constant 0 : index
    %c0_3 = arith.constant 0 : index
    %c6 = arith.constant 6 : index
    %2 = vector.load %arg2[%c0_2, %c0_3, %c6] : memref<5x10x11xf32, #tpu.memory_space<vmem>>, vector<1x10x1xf32>
    %3 = vector.shape_cast %2 : vector<1x10x1xf32> to vector<10x1xf32>
    %c1 = arith.constant 1 : index
    %c0_4 = arith.constant 0 : index
    %c0_5 = arith.constant 0 : index
    %4 = vector.load %arg2[%c1, %c0_4, %c0_5] : memref<5x10x11xf32, #tpu.memory_space<vmem>>, vector<1x10x10xf32>
    %5 = vector.shape_cast %4 : vector<1x10x10xf32> to vector<10x10xf32>
    %c1_6 = arith.constant 1 : index
    %c0_7 = arith.constant 0 : index
    %c10 = arith.constant 10 : index
    %6 = vector.load %arg2[%c1_6, %c0_7, %c10] : memref<5x10x11xf32, #tpu.memory_space<vmem>>, vector<1x10x1xf32>
    %7 = vector.shape_cast %6 : vector<1x10x1xf32> to vector<10x1xf32>
    %c2 = arith.constant 2 : index
    %c0_8 = arith.constant 0 : index
    %c0_9 = arith.constant 0 : index
    %8 = vector.load %arg2[%c2, %c0_8, %c0_9] : memref<5x10x11xf32, #tpu.memory_space<vmem>>, vector<1x10x10xf32>
    %9 = vector.shape_cast %8 : vector<1x10x10xf32> to vector<10x10xf32>
    %c2_10 = arith.constant 2 : index
    %c0_11 = arith.constant 0 : index
    %c10_12 = arith.constant 10 : index
    %10 = vector.load %arg2[%c2_10, %c0_11, %c10_12] : memref<5x10x11xf32, #tpu.memory_space<vmem>>, vector<1x10x1xf32>
    %11 = vector.shape_cast %10 : vector<1x10x1xf32> to vector<10x1xf32>
    %c3 = arith.constant 3 : index
    %c0_13 = arith.constant 0 : index
    %c0_14 = arith.constant 0 : index
    %12 = vector.load %arg2[%c3, %c0_13, %c0_14] : memref<5x10x11xf32, #tpu.memory_space<vmem>>, vector<1x10x10xf32>
    %13 = vector.shape_cast %12 : vector<1x10x10xf32> to vector<10x10xf32>
    %c3_15 = arith.constant 3 : index
    %c0_16 = arith.constant 0 : index
    %c10_17 = arith.constant 10 : index
    %14 = vector.load %arg2[%c3_15, %c0_16, %c10_17] : memref<5x10x11xf32, #tpu.memory_space<vmem>>, vector<1x10x1xf32>
    %15 = vector.shape_cast %14 : vector<1x10x1xf32> to vector<10x1xf32>
    %c4 = arith.constant 4 : index
    %c0_18 = arith.constant 0 : index
    %c0_19 = arith.constant 0 : index
    %16 = vector.load %arg2[%c4, %c0_18, %c0_19] : memref<5x10x11xf32, #tpu.memory_space<vmem>>, vector<1x3x10xf32>
    %17 = vector.shape_cast %16 : vector<1x3x10xf32> to vector<3x10xf32>
    %c4_20 = arith.constant 4 : index
    %c0_21 = arith.constant 0 : index
    %c10_22 = arith.constant 10 : index
    %18 = vector.load %arg2[%c4_20, %c0_21, %c10_22] : memref<5x10x11xf32, #tpu.memory_space<vmem>>, vector<1x3x1xf32>
    %19 = vector.shape_cast %18 : vector<1x3x1xf32> to vector<3x1xf32>
    %c0_i32 = arith.constant 0 : i32
    %c512_i32 = arith.constant 512 : i32
    %20 = arith.muli %c0_i32, %c512_i32 : i32
    %21 = tpu.assume_multiple %20, 512 : i32
    %c0_23 = arith.constant 0 : index
    %22 = arith.index_cast %21 : i32 to index
    %23 = vector.load %arg1[%c0_23, %22] : memref<6x512xf32, #tpu.memory_space<vmem>>, vector<6x512xf32>
    %cst = arith.constant dense<0.000000e+00> : vector<10x512xf32>
    %24 = tpu.matmul %1, %23, %cst {dimension_numbers = #tpu.dot_dimension_numbers<[1], [0], [0], [1], [0, 0, 1, 1], [], []>} : vector<10x6xf32>, vector<6x512xf32>, vector<10x512xf32> -> vector<10x512xf32>
    %25 = vector.broadcast %3 : vector<10x1xf32> to vector<10x512xf32>
    %26 = arith.addf %24, %25 : vector<10x512xf32>
    %cst_24 = arith.constant 0.000000e+00 : f32
    %27 = vector.broadcast %cst_24 : f32 to vector<10x512xf32>
    %28 = arith.maximumf %26, %27 : vector<10x512xf32>
    %cst_25 = arith.constant dense<0.000000e+00> : vector<10x512xf32>
    %29 = tpu.matmul %5, %28, %cst_25 {dimension_numbers = #tpu.dot_dimension_numbers<[1], [0], [0], [1], [0, 0, 1, 1], [], []>} : vector<10x10xf32>, vector<10x512xf32>, vector<10x512xf32> -> vector<10x512xf32>
    %30 = vector.broadcast %7 : vector<10x1xf32> to vector<10x512xf32>
    %31 = arith.addf %29, %30 : vector<10x512xf32>
    %cst_26 = arith.constant 0.000000e+00 : f32
    %32 = vector.broadcast %cst_26 : f32 to vector<10x512xf32>
    %33 = arith.maximumf %31, %32 : vector<10x512xf32>
    %cst_27 = arith.constant dense<0.000000e+00> : vector<10x512xf32>
    %34 = tpu.matmul %9, %33, %cst_27 {dimension_numbers = #tpu.dot_dimension_numbers<[1], [0], [0], [1], [0, 0, 1, 1], [], []>} : vector<10x10xf32>, vector<10x512xf32>, vector<10x512xf32> -> vector<10x512xf32>
    %35 = vector.broadcast %11 : vector<10x1xf32> to vector<10x512xf32>
    %36 = arith.addf %34, %35 : vector<10x512xf32>
    %cst_28 = arith.constant 0.000000e+00 : f32
    %37 = vector.broadcast %cst_28 : f32 to vector<10x512xf32>
    %38 = arith.maximumf %36, %37 : vector<10x512xf32>
    %cst_29 = arith.constant dense<0.000000e+00> : vector<10x512xf32>
    %39 = tpu.matmul %13, %38, %cst_29 {dimension_numbers = #tpu.dot_dimension_numbers<[1], [0], [0], [1], [0, 0, 1, 1], [], []>} : vector<10x10xf32>, vector<10x512xf32>, vector<10x512xf32> -> vector<10x512xf32>
    %40 = vector.broadcast %15 : vector<10x1xf32> to vector<10x512xf32>
    %41 = arith.addf %39, %40 : vector<10x512xf32>
    %cst_30 = arith.constant 0.000000e+00 : f32
    %42 = vector.broadcast %cst_30 : f32 to vector<10x512xf32>
    %43 = arith.maximumf %41, %42 : vector<10x512xf32>
    %cst_31 = arith.constant dense<0.000000e+00> : vector<3x512xf32>
    %44 = tpu.matmul %17, %43, %cst_31 {dimension_numbers = #tpu.dot_dimension_numbers<[1], [0], [0], [1], [0, 0, 1, 1], [], []>} : vector<3x10xf32>, vector<10x512xf32>, vector<3x512xf32> -> vector<3x512xf32>
    %45 = vector.broadcast %19 : vector<3x1xf32> to vector<3x512xf32>
    %46 = arith.addf %44, %45 : vector<3x512xf32>
    %c0_32 = arith.constant 0 : index
    %47 = arith.index_cast %21 : i32 to index
    %48 = vector.load %arg3[%c0_32, %47] : memref<3x512xf32, #tpu.memory_space<vmem>>, vector<3x512xf32>
    tpu.vector_store %arg3[%c0_32, %47], %46 {strides = array<i32>} : memref<3x512xf32, #tpu.memory_space<vmem>>, vector<3x512xf32>,
    %c1_i32 = arith.constant 1 : i32
    return
  }
  func.func @transform_0(%arg0: i32) -> (i32, i32) {
    %c0_i32 = arith.constant 0 : i32
    %c0_i32_0 = arith.constant 0 : i32
    return %c0_i32, %arg0 : i32, i32
  }
  func.func @transform_1(%arg0: i32) -> (i32, i32, i32) {
    %c0_i32 = arith.constant 0 : i32
    %c0_i32_0 = arith.constant 0 : i32
    %c0_i32_1 = arith.constant 0 : i32
    %c0_i32_2 = arith.constant 0 : i32
    return %c0_i32, %c0_i32_0, %c0_i32_1 : i32, i32, i32
  }
  func.func @transform_2(%arg0: i32) -> (i32, i32) {
    %c0_i32 = arith.constant 0 : i32
    %c0_i32_0 = arith.constant 0 : i32
    return %c0_i32, %arg0 : i32, i32
  }
}

</mosaic_0001>

<bundles_post_ra>
// kernel: simple_nn_forward.1
= control target key start
LH: loop header
LB: loop body
LE: loop exit
PB: predicated region body
PF: predicated region fallthrough
CT: control target
= control target key end

     0   :  { %vm43_vm0 = vcmask 1045504   ;;  %vm38_vm1 = vcmask 48128   ;;  %v721_v3 = vmov 6   ;;  %v722_v8 = vmov 10   ;;  %s849_s0 = inlined_call_operand.vmem [shape: f32[6,512], index: 0, kind: input, shape index: {}]   ;;  %s850_s1 = inlined_call_operand.vmem [shape: f32[5,10,11], index: 1, kind: input, shape index: {}]   ;;  %s851_s2 = inlined_call_operand.vmem [shape: f32[3,512], index: 2, kind: output, shape index: {}]  }
   0x1   :  { %v24_v0 = vld [vmem:[%s849_s0] sm:$0x3f]  ;;  %v25_v1 = vld [vmem:[%s849_s0 + $0x8] sm:$0x3f]  ;;  %v26_v2 = vld [vmem:[%s849_s0 + $0x10] sm:$0x3f]  ;;  %717 = vset.pattern.permute.xlu0 %v721_v3  ;;  %718 = vset.pattern.permute.xlu1 %v722_v8 }
   0x2   :  { %659 = vmatpush.msk.msra.mxu0 %vm43_vm0, %v24_v0  ;;  %662 = vmatpush.msk.msra.mxu1 %vm43_vm0, %v25_v1  ;;  %v27_v4 = vld [vmem:[%s849_s0 + $0x18] sm:$0x3f]  ;;  %v11_v5 = vld [vmem:[%s850_s1] sm:$0xff]  ;;  %v12_v6 = vld [vmem:[%s850_s1 + $0x8] sm:$0x3]  ;;  %vm171_vm2 = vcmask 1041408  }
   0x3   :  { %665 = vmatpush.msk.msra.mxu2 %vm43_vm0, %v26_v2  ;;  %668 = vmatpush.msk.msra.mxu3 %vm43_vm0, %v27_v4  ;;  %v653_v7 = vld [vmem:[%s850_s1 + $0x18] sm:$0x3]  ;;  %v652_v12 = vld [vmem:[%s850_s1 + $0x10] sm:$0xff]  ;;  %vm166_vm3 = vcmask 80896   ;;  %v655_v37 = vld [vmem:[%s850_s1 + $0x28] sm:$0x3] }
   0x4   :  { %660 = vmatmul.msk.f32.vlgmr.msra.gmra.mxu0 %vm38_vm1, %v11_v5  ;;  %663 = vmatmul.msk.f32.vlgmr.msra.gmra.mxu1 %vm38_vm1, %v11_v5  ;;  %v773_v14 = vld [vmem:[%s850_s1 + $0x30] sm:$0xff]  ;;  %v654_v41 = vld [vmem:[%s850_s1 + $0x20] sm:$0xff]  ;;  %v657_v2 = vld [vmem:[%s850_s1 + $0x38] sm:$0x3]  ;;  %vm641_vm4 = vcmask 1043456  }
   0x5   :  { %666 = vmatmul.msk.f32.vlgmr.msra.gmra.mxu2 %vm38_vm1, %v11_v5  ;;  %669 = vmatmul.msk.f32.vlgmr.msra.gmra.mxu3 %vm38_vm1, %v11_v5  ;;  %v797_v43 = vld [vmem:[%s850_s1 + $0x40] sm:$0x7] }
   0x6   :  { %35 = vperm.xlu0 %717, %v12_v6   ;;  %719 = vset.pattern.permute.xlu2 %v722_v8 }
   0x7   :  { %163 = vperm.xlu1 %718, %v653_v7   ;;  %291 = vperm.xlu2 %719, %v655_v37  }
   0xc   :  { %661 = vmatmul.msk.f32.gmra.mxu0 %vm38_vm1, %v12_v6  ;;  %664 = vmatmul.msk.f32.gmra.mxu1 %vm38_vm1, %v12_v6 }
   0xd   :  { %667 = vmatmul.msk.f32.gmra.mxu2 %vm38_vm1, %v12_v6  ;;  %670 = vmatmul.msk.f32.gmra.mxu3 %vm38_vm1, %v12_v6 }
   0xe   :  { %30 = vperm.xlu0 %717, %v11_v5  }
   0xf   :  { %158 = vperm.xlu1 %718, %v652_v12   ;;  %286 = vperm.xlu2 %719, %v654_v41  }
  0x16   :  { %720 = vset.pattern.permute.xlu0 %v722_v8 }
  0x17   :  { %412 = vperm.xlu1 %718, %v773_v14   ;;  %538 = vperm.xlu2 %719, %v797_v43  }
  0x18   :  { %417 = vperm.xlu0 %720, %v657_v2  }
  0x61   :  { %v292_v3 = vpop.permute.xlu2 %291 }
  0x69   :  { %v287_v6 = vpop.permute.xlu2 %286 }
  0x78   :  { %v36_v9 = vpop.permute.xlu0 %35 }
  0x79   :  { %v164_v38 = vpop.permute.xlu1 %163 }
  0x80   :  { %v31_v13 = vpop.permute.xlu0 %30 }
  0x81   :  { %v73_v10 = vpop.f32.mrf.mxu0  ;;  %v96_v11 = vpop.f32.mrf.mxu1 }
  0x82   :  { %v74_v21 = vadd.f32 %v73_v10, %v31_v13  ;;  %v97_v22 = vadd.f32 %v96_v11, %v31_v13  ;;  %v159_v42 = vpop.permute.xlu1 %158 }
  0x84   :  { %v148_v25 = vmax.f32 %v74_v21, 0.0  ;;  %v149_v26 = vmax.f32 %v97_v22, 0.0 }
  0x88   :  { %v119_v15 = vpop.f32.mrf.mxu2  ;;  %v142_v16 = vpop.f32.mrf.mxu3 }
  0x89   :  { %v76_v17 = vpop.f32.mrf.mxu0  ;;  %v99_v18 = vpop.f32.mrf.mxu1  ;;  %v120_v27 = vadd.f32 %v119_v15, %v31_v13  ;;  %v143_v30 = vadd.f32 %v142_v16, %v31_v13 }
  0x8a   :  { %v77_v19 = vadd.f32 %v76_v17, %v36_v9  ;;  %v100_v20 = vadd.f32 %v99_v18, %v36_v9 }
  0x8b   :  { %v150_v35 = vmax.f32 %v120_v27, 0.0  ;;  %v151_v36 = vmax.f32 %v143_v30, 0.0 }
  0x8c   :  { %v152_v23 = vmax.f32 %v77_v19, 0.0  ;;  %v153_v24 = vmax.f32 %v100_v20, 0.0 }
  0x8e   :  { %671 = vmatpush.msk.msrb.mxu0 %vm171_vm2, %v152_v23  ;;  %674 = vmatpush.msk.msrb.mxu1 %vm171_vm2, %v153_v24 }
  0x90   :  { %v122_v28 = vpop.f32.mrf.mxu2  ;;  %v145_v29 = vpop.f32.mrf.mxu3  ;;  %199 = vmatpush.msrb.mxu0 %v148_v25  ;;  %222 = vmatpush.msrb.mxu1 %v149_v26 }
  0x91   :  { %v123_v31 = vadd.f32 %v122_v28, %v36_v9  ;;  %v146_v32 = vadd.f32 %v145_v29, %v36_v9  ;;  %672 = vmatmul.msk.f32.vlgmr.msrb.gmra.mxu0 %vm166_vm3, %v652_v12  ;;  %675 = vmatmul.msk.f32.vlgmr.msrb.gmra.mxu1 %vm166_vm3, %v652_v12 }
  0x93   :  { %v154_v33 = vmax.f32 %v123_v31, 0.0  ;;  %v155_v34 = vmax.f32 %v146_v32, 0.0  ;;  %v418_v32 = vpop.permute.xlu0 %417 }
  0x95   :  { %677 = vmatpush.msk.msrb.mxu2 %vm171_vm2, %v154_v33  ;;  %680 = vmatpush.msk.msrb.mxu3 %vm171_vm2, %v155_v34  ;;  %v413_v33 = vpop.permute.xlu1 %412 }
  0x97   :  { %245 = vmatpush.msrb.mxu2 %v150_v35  ;;  %268 = vmatpush.msrb.mxu3 %v151_v36 }
  0x98   :  { %678 = vmatmul.msk.f32.vlgmr.msrb.gmra.mxu2 %vm166_vm3, %v652_v12  ;;  %681 = vmatmul.msk.f32.vlgmr.msrb.gmra.mxu3 %vm166_vm3, %v652_v12 }
  0x99   :  { %673 = vmatmul.msk.f32.gmra.mxu0 %vm166_vm3, %v653_v7  ;;  %676 = vmatmul.msk.f32.gmra.mxu1 %vm166_vm3, %v653_v7 }
  0xa0   :  { %679 = vmatmul.msk.f32.gmra.mxu2 %vm166_vm3, %v653_v7  ;;  %682 = vmatmul.msk.f32.gmra.mxu3 %vm166_vm3, %v653_v7 }
 0x10e   :  { %v201_v39 = vpop.f32.mrf.mxu0  ;;  %v224_v40 = vpop.f32.mrf.mxu1 }
 0x10f   :  { %v202_v44 = vadd.f32 %v201_v39, %v159_v42  ;;  %v225_v45 = vadd.f32 %v224_v40, %v159_v42 }
 0x111   :  { %v276_v52 = vmax.f32 %v202_v44, 0.0  ;;  %v277_v53 = vmax.f32 %v225_v45, 0.0 }
 0x116   :  { %v204_v46 = vpop.f32.mrf.mxu0  ;;  %v227_v47 = vpop.f32.mrf.mxu1 }
 0x117   :  { %v205_v48 = vadd.f32 %v204_v46, %v164_v38  ;;  %v228_v49 = vadd.f32 %v227_v47, %v164_v38 }
 0x119   :  { %v280_v50 = vmax.f32 %v205_v48, 0.0  ;;  %v281_v51 = vmax.f32 %v228_v49, 0.0 }
 0x11b   :  { %v247_v54 = vpop.f32.mrf.mxu2  ;;  %v270_v55 = vpop.f32.mrf.mxu3  ;;  %683 = vmatpush.msk.msra.mxu0 %vm171_vm2, %v280_v50  ;;  %686 = vmatpush.msk.msra.mxu1 %vm171_vm2, %v281_v51 }
 0x11c   :  { %v248_v58 = vadd.f32 %v247_v54, %v159_v42  ;;  %v271_v59 = vadd.f32 %v270_v55, %v159_v42 }
 0x11d   :  { %325 = vmatpush.msra.mxu0 %v276_v52  ;;  %348 = vmatpush.msra.mxu1 %v277_v53 }
 0x11e   :  { %684 = vmatmul.msk.f32.vlgmr.msra.gmra.mxu0 %vm166_vm3, %v654_v41  ;;  %687 = vmatmul.msk.f32.vlgmr.msra.gmra.mxu1 %vm166_vm3, %v654_v41  ;;  %v278_v0 = vmax.f32 %v248_v58, 0.0  ;;  %v279_v1 = vmax.f32 %v271_v59, 0.0 }
 0x123   :  { %v250_v56 = vpop.f32.mrf.mxu2  ;;  %v273_v57 = vpop.f32.mrf.mxu3 }
 0x124   :  { %v251_v60 = vadd.f32 %v250_v56, %v164_v38  ;;  %v274_v61 = vadd.f32 %v273_v57, %v164_v38  ;;  %v539_v56 = vpop.permute.xlu2 %538 }
 0x126   :  { %v282_v62 = vmax.f32 %v251_v60, 0.0  ;;  %v283_v63 = vmax.f32 %v274_v61, 0.0  ;;  %685 = vmatmul.msk.f32.gmra.mxu0 %vm166_vm3, %v655_v37  ;;  %688 = vmatmul.msk.f32.gmra.mxu1 %vm166_vm3, %v655_v37 }
 0x128   :  { %689 = vmatpush.msk.msra.mxu2 %vm171_vm2, %v282_v62  ;;  %692 = vmatpush.msk.msra.mxu3 %vm171_vm2, %v283_v63 }
 0x12a   :  { %371 = vmatpush.msra.mxu2 %v278_v0  ;;  %394 = vmatpush.msra.mxu3 %v279_v1 }
 0x12b   :  { %690 = vmatmul.msk.f32.vlgmr.msra.gmra.mxu2 %vm166_vm3, %v654_v41  ;;  %693 = vmatmul.msk.f32.vlgmr.msra.gmra.mxu3 %vm166_vm3, %v654_v41 }
 0x133   :  { %691 = vmatmul.msk.f32.gmra.mxu2 %vm166_vm3, %v655_v37  ;;  %694 = vmatmul.msk.f32.gmra.mxu3 %vm166_vm3, %v655_v37 }
 0x19b   :  { %v327_v4 = vpop.f32.mrf.mxu0  ;;  %v350_v5 = vpop.f32.mrf.mxu1 }
 0x19c   :  { %v328_v7 = vadd.f32 %v327_v4, %v287_v6  ;;  %v351_v8 = vadd.f32 %v350_v5, %v287_v6 }
 0x19e   :  { %v402_v16 = vmax.f32 %v328_v7, 0.0  ;;  %v403_v17 = vmax.f32 %v351_v8, 0.0 }
 0x1a3   :  { %v330_v9 = vpop.f32.mrf.mxu0  ;;  %v353_v10 = vpop.f32.mrf.mxu1 }
 0x1a4   :  { %v331_v11 = vadd.f32 %v330_v9, %v292_v3  ;;  %v354_v12 = vadd.f32 %v353_v10, %v292_v3 }
 0x1a6   :  { %v406_v13 = vmax.f32 %v331_v11, 0.0  ;;  %v407_v15 = vmax.f32 %v354_v12, 0.0 }
 0x1a8   :  { %695 = vmatpush.msk.msrb.mxu0 %vm171_vm2, %v406_v13  ;;  %698 = vmatpush.msk.msrb.mxu1 %vm171_vm2, %v407_v15 }
 0x1aa   :  { %451 = vmatpush.msrb.mxu0 %v402_v16  ;;  %474 = vmatpush.msrb.mxu1 %v403_v17 }
 0x1ab   :  { %696 = vmatmul.msk.f32.vlgmr.msrb.gmra.mxu0 %vm166_vm3, %v773_v14  ;;  %699 = vmatmul.msk.f32.vlgmr.msrb.gmra.mxu1 %vm166_vm3, %v773_v14 }
 0x1ae   :  { %v373_v18 = vpop.f32.mrf.mxu2  ;;  %v396_v19 = vpop.f32.mrf.mxu3 }
 0x1af   :  { %v374_v22 = vadd.f32 %v373_v18, %v287_v6  ;;  %v397_v23 = vadd.f32 %v396_v19, %v287_v6 }
 0x1b1   :  { %v404_v28 = vmax.f32 %v374_v22, 0.0  ;;  %v405_v29 = vmax.f32 %v397_v23, 0.0 }
 0x1b3   :  { %697 = vmatmul.msk.f32.gmra.mxu0 %vm166_vm3, %v657_v2  ;;  %700 = vmatmul.msk.f32.gmra.mxu1 %vm166_vm3, %v657_v2 }
 0x1b6   :  { %v376_v20 = vpop.f32.mrf.mxu2  ;;  %v399_v21 = vpop.f32.mrf.mxu3 }
 0x1b7   :  { %v377_v24 = vadd.f32 %v376_v20, %v292_v3  ;;  %v400_v25 = vadd.f32 %v399_v21, %v292_v3 }
 0x1b9   :  { %v408_v26 = vmax.f32 %v377_v24, 0.0  ;;  %v409_v27 = vmax.f32 %v400_v25, 0.0 }
 0x1bb   :  { %701 = vmatpush.msk.msrb.mxu2 %vm171_vm2, %v408_v26  ;;  %704 = vmatpush.msk.msrb.mxu3 %vm171_vm2, %v409_v27 }
 0x1bd   :  { %497 = vmatpush.msrb.mxu2 %v404_v28  ;;  %520 = vmatpush.msrb.mxu3 %v405_v29 }
 0x1be   :  { %702 = vmatmul.msk.f32.vlgmr.msrb.gmra.mxu2 %vm166_vm3, %v773_v14  ;;  %705 = vmatmul.msk.f32.vlgmr.msrb.gmra.mxu3 %vm166_vm3, %v773_v14 }
 0x1c6   :  { %703 = vmatmul.msk.f32.gmra.mxu2 %vm166_vm3, %v657_v2  ;;  %706 = vmatmul.msk.f32.gmra.mxu3 %vm166_vm3, %v657_v2 }
 0x228   :  { %v453_v30 = vpop.f32.mrf.mxu0  ;;  %v476_v31 = vpop.f32.mrf.mxu1 }
 0x229   :  { %v454_v36 = vadd.f32 %v453_v30, %v413_v33  ;;  %v477_v37 = vadd.f32 %v476_v31, %v413_v33 }
 0x22b   :  { %v528_v42 = vmax.f32 %v454_v36, 0.0  ;;  %v529_v44 = vmax.f32 %v477_v37, 0.0 }
 0x230   :  { %v456_v34 = vpop.f32.mrf.mxu0  ;;  %v479_v35 = vpop.f32.mrf.mxu1 }
 0x231   :  { %v457_v38 = vadd.f32 %v456_v34, %v418_v32  ;;  %v480_v39 = vadd.f32 %v479_v35, %v418_v32 }
 0x233   :  { %v532_v40 = vmax.f32 %v457_v38, 0.0  ;;  %v533_v41 = vmax.f32 %v480_v39, 0.0 }
 0x235   :  { %707 = vmatpush.msk.msra.mxu0 %vm171_vm2, %v532_v40  ;;  %709 = vmatpush.msk.msra.mxu1 %vm171_vm2, %v533_v41 }
 0x237   :  { %570 = vmatpush.msra.mxu0 %v528_v42  ;;  %590 = vmatpush.msra.mxu1 %v529_v44 }
 0x238   :  { %708 = vmatmul.msk.f32.vlgmr.msra.gmra.mxu0 %vm166_vm3, %v797_v43  ;;  %710 = vmatmul.msk.f32.vlgmr.msra.gmra.mxu1 %vm166_vm3, %v797_v43 }
 0x241   :  { %v499_v14 = vpop.f32.mrf.mxu2  ;;  %v522_v45 = vpop.f32.mrf.mxu3 }
 0x242   :  { %v500_v48 = vadd.f32 %v499_v14, %v413_v33  ;;  %v523_v49 = vadd.f32 %v522_v45, %v413_v33 }
 0x244   :  { %v530_v54 = vmax.f32 %v500_v48, 0.0  ;;  %v531_v55 = vmax.f32 %v523_v49, 0.0 }
 0x249   :  { %v502_v46 = vpop.f32.mrf.mxu2  ;;  %v525_v47 = vpop.f32.mrf.mxu3 }
 0x24a   :  { %v503_v50 = vadd.f32 %v502_v46, %v418_v32  ;;  %v526_v51 = vadd.f32 %v525_v47, %v418_v32 }
 0x24c   :  { %v534_v52 = vmax.f32 %v503_v50, 0.0  ;;  %v535_v53 = vmax.f32 %v526_v51, 0.0 }
 0x24e   :  { %711 = vmatpush.msk.msra.mxu2 %vm171_vm2, %v534_v52  ;;  %713 = vmatpush.msk.msra.mxu3 %vm171_vm2, %v535_v53 }
 0x250   :  { %610 = vmatpush.msra.mxu2 %v530_v54  ;;  %630 = vmatpush.msra.mxu3 %v531_v55 }
 0x251   :  { %712 = vmatmul.msk.f32.vlgmr.msra.gmra.mxu2 %vm166_vm3, %v797_v43  ;;  %714 = vmatmul.msk.f32.vlgmr.msra.gmra.mxu3 %vm166_vm3, %v797_v43 }
 0x2b5   :  { %v572_v57 = vpop.f32.mrf.mxu0  ;;  %v592_v58 = vpop.f32.mrf.mxu1 }
 0x2b6   :  { %v593_v59 = vadd.f32 %v592_v58, %v539_v56  ;;  %v573_v60 = vadd.f32 %v572_v57, %v539_v56 }
 0x2b8   :  { %v639_v61 = vrot.slane %v593_v59, 4 }
 0x2ba   :  { %v642_v62 = vsel %vm641_vm4, %v573_v60, %v639_v61 }
 0x2bb   :  { %646 = vst [vmem:[%s851_s2] sm:$0x77] %v642_v62 }
 0x2d4   :  { %v612_v63 = vpop.f32.mrf.mxu2  ;;  %v632_v0 = vpop.f32.mrf.mxu3 }
 0x2d5   :  { %v633_v1 = vadd.f32 %v632_v0, %v539_v56  ;;  %v613_v2 = vadd.f32 %v612_v63, %v539_v56 }
 0x2d7   :  { %v640_v3 = vrot.slane %v633_v1, 4 }
 0x2d9   :  { %v643_v4 = vsel %vm641_vm4, %v613_v2, %v640_v3 }
 0x2da   :  { %647 = vst [vmem:[%s851_s2 + $0x8] sm:$0x77] %v643_v4 }

</bundles_post_ra>
